<compile_context>
chip_gen: v7x
topology: tpu7x:2x2x1
jax: 0.10.0
libtpu: 0.0.40
codegen_flags: <defaults>
</compile_context>

<pallas_src>
import functools

import jax
import jax.numpy as jnp
from jax.experimental import pallas as pl
from jax.experimental.pallas import tpu as pltpu

_LANES = 128
_MAX_TILE_ROWS = 2048  # (2048, 128) f32 block = 1 MiB per input per grid step


def _round_up(x, m):
    return ((x + m - 1) // m) * m


def _rmse_sum_kernel(yp_ref, yt_ref, acc_ref, *, eps, n_valid):
    """Grid = (num_blocks,). acc_ref is a single (8,128) f32 output block whose index_map is
    constant, so it stays resident in VMEM across the whole reduction and is written back to
    HBM once at the end. Zeroed at step 0, accumulated every step (pure VPU under the DMA)."""
    i = pl.program_id(0)

    @pl.when(i == 0)
    def _():
        acc_ref[...] = jnp.zeros_like(acc_ref)

    tr = yp_ref.shape[0]
    d = yp_ref[...].astype(jnp.float32) - yt_ref[...].astype(jnp.float32)
    term = jnp.sqrt(d * d + jnp.float32(eps))

    if n_valid is not None:
        # Exact tail handling: mask by global element index against the (static) valid count.
        # Out-of-bounds rows of a ragged last block may contain garbage; the select drops them.
        row = jax.lax.broadcasted_iota(jnp.int32, (tr, _LANES), 0)
        lane = jax.lax.broadcasted_iota(jnp.int32, (tr, _LANES), 1)
        idx = (i * tr + row) * _LANES + lane
        term = jnp.where(idx < n_valid, term, 0.0)

    # On-chip partial reduce: (tr,128) -> (tr//8, 8, 128), sum over the leading axis.
    # This never crosses an (8,128) tile boundary, so it is layout-free; the adds are VPU-only.
    acc_ref[...] += jnp.sum(term.reshape(tr // 8, 8, _LANES), axis=0)


def _rmse_elem_kernel(yp_ref, yt_ref, out_ref, *, eps):
    """reduction='none': per-element sqrt((yp-yt)^2 + eps)."""
    d = yp_ref[...].astype(jnp.float32) - yt_ref[...].astype(jnp.float32)
    out_ref[...] = jnp.sqrt(d * d + jnp.float32(eps)).astype(out_ref.dtype)


def _to_rows128(x):
    """Row-major flatten to (rows, 128) with rows = ceil(n/128).

    When n is a multiple of 128 (common for NN tensors) this is a free reshape: no copy, no
    dtype cast. Otherwise the flat array is zero-padded to the next multiple of 128; the pad
    values never reach the result (the sum kernel masks by element index, the 'none' path
    slices the tail off)."""
    n = x.size
    flat = jnp.reshape(x, (-1,))
    rows = -(-n // _LANES)
    pad = rows * _LANES - n
    if pad:
        # TODO(synk): for lane-ragged sizes this pad is one extra HBM pass over the inputs;
        # avoiding it entirely would need manual DMA from a flat HBM ref (memory_space=pl.ANY).
        flat = jnp.pad(flat, (0, pad))
    return jnp.reshape(flat, (rows, _LANES)), rows


def rmse_loss(y_pred, y_true, reduction="mean", eps=1e-9):
    assert y_pred.shape == y_true.shape
    n = int(y_pred.size)

    # Native sublane packing: 8 rows for 32-bit, 16 for 16-bit, 32 for 8-bit dtypes.
    itemsize = jnp.dtype(y_pred.dtype).itemsize
    sub_mult = 8 * max(1, 4 // max(1, itemsize))

    yp2d, rows = _to_rows128(y_pred)
    yt2d, _ = _to_rows128(y_true)

    tile_rows = min(_MAX_TILE_ROWS, _round_up(rows, sub_mult))
    num_blocks = -(-rows // tile_rows)
    covered = num_blocks * tile_rows * _LANES
    n_valid = n if covered != n else None  # None => fully aligned => mask-free kernel

    in_specs = [
        pl.BlockSpec((tile_rows, _LANES), lambda i: (i, 0)),
        pl.BlockSpec((tile_rows, _LANES), lambda i: (i, 0)),
    ]

    if reduction in ("mean", "sum"):
        kernel = functools.partial(_rmse_sum_kernel, eps=float(eps), n_valid=n_valid)
        partial_sums = pl.pallas_call(
            kernel,
            out_shape=jax.ShapeDtypeStruct((8, _LANES), jnp.float32),
            grid_spec=pltpu.PrefetchScalarGridSpec(
                num_scalar_prefetch=0,
                grid=(num_blocks,),
                in_specs=in_specs,
                # Constant block index -> resident accumulator, single writeback at the end.
                out_specs=pl.BlockSpec((8, _LANES), lambda i: (0, 0)),
            ),
            compiler_params=pltpu.CompilerParams(
                dimension_semantics=("arbitrary",)),
        )(yp2d, yt2d)

        total = jnp.sum(partial_sums)  # tiny: 1024 f32
        if reduction == "mean":
            total = total / jnp.float32(n)
        return total.astype(y_pred.dtype)

    elif reduction == "none":
        kernel = functools.partial(_rmse_elem_kernel, eps=float(eps))
        out2d = pl.pallas_call(
            kernel,
            out_shape=jax.ShapeDtypeStruct((rows, _LANES), y_pred.dtype),
            grid_spec=pltpu.PrefetchScalarGridSpec(
                num_scalar_prefetch=0,
                grid=(num_blocks,),
                in_specs=in_specs,
                out_specs=pl.BlockSpec((tile_rows, _LANES), lambda i: (i, 0)),
            ),
            compiler_params=pltpu.CompilerParams(
                dimension_semantics=("parallel",)),
        )(yp2d, yt2d)

        if rows * _LANES == n:
            # Aligned sizes: pure reshape back, no extra copy.
            return jnp.reshape(out2d, y_pred.shape)
        # Lane-ragged tail: one trailing slice copy to restore the original layout.
        return jnp.reshape(jnp.reshape(out2d, (-1,))[:n], y_pred.shape)

    else:
        raise ValueError(f"unknown reduction: {reduction}")


if __name__ == "__main__":
    key = jax.random.PRNGKey(0)
    k1, k2, k3, k4, k5, k6 = jax.random.split(key, 6)
    eps = 1e-9

    # Primary small NCHW-style shape (aligned, mask-free path).
    y_pred = jax.random.normal(k1, (2, 4, 16, 16), dtype=jnp.float32)
    y_true = jax.random.normal(k2, (2, 4, 16, 16), dtype=jnp.float32)

    loss = jax.block_until_ready(rmse_loss(y_pred, y_true, reduction="mean", eps=eps))
    ref = jnp.mean(jnp.sqrt((y_pred - y_true) ** 2 + eps))
    assert jnp.allclose(loss, ref, rtol=1e-5, atol=1e-6), (loss, ref)

    loss_sum = jax.block_until_ready(rmse_loss(y_pred, y_true, reduction="sum", eps=eps))
    ref_sum = jnp.sum(jnp.sqrt((y_pred - y_true) ** 2 + eps))
    assert jnp.allclose(loss_sum, ref_sum, rtol=1e-5, atol=1e-4), (loss_sum, ref_sum)

    loss_none = jax.block_until_ready(rmse_loss(y_pred, y_true, reduction="none", eps=eps))
    ref_none = jnp.sqrt((y_pred - y_true) ** 2 + eps)
    assert loss_none.shape == y_pred.shape
    assert jnp.allclose(loss_none, ref_none, rtol=1e-5, atol=1e-6)

    # Ragged element count: exercises the exact in-kernel masking (no sqrt(eps) bias hack).
    yp_r = jax.random.normal(k3, (3, 5, 37, 29), dtype=jnp.float32)
    yt_r = jax.random.normal(k4, (3, 5, 37, 29), dtype=jnp.float32)
    loss_r = jax.block_until_ready(rmse_loss(yp_r, yt_r, reduction="mean", eps=eps))
    ref_r = jnp.mean(jnp.sqrt((yp_r - yt_r) ** 2 + eps))
    assert jnp.allclose(loss_r, ref_r, rtol=1e-5, atol=1e-5), (loss_r, ref_r)

    loss_rn = jax.block_until_ready(rmse_loss(yp_r, yt_r, reduction="none", eps=eps))
    ref_rn = jnp.sqrt((yp_r - yt_r) ** 2 + eps)
    assert jnp.allclose(loss_rn, ref_rn, rtol=1e-5, atol=1e-6)

    # Multi-block size: exercises the resident (8,128) accumulator across grid steps.
    yp_b = jax.random.normal(k5, (4, 16, 64, 128), dtype=jnp.float32)
    yt_b = jax.random.normal(k6, (4, 16, 64, 128), dtype=jnp.float32)
    loss_b = jax.block_until_ready(rmse_loss(yp_b, yt_b, reduction="mean", eps=eps))
    ref_b = jnp.mean(jnp.sqrt((yp_b - yt_b) ** 2 + eps))
    assert jnp.allclose(loss_b, ref_b, rtol=1e-5, atol=1e-5), (loss_b, ref_b)

    print("KERNEL_OK")
</pallas_src>

<mosaic_0001>
module attributes {stable_mosaic.version = 11 : i64} {
  func.func @_rmse_sum_kernel(%arg0: i32, %arg1: memref<16x128xf32, #tpu.memory_space<vmem>>, %arg2: memref<16x128xf32, #tpu.memory_space<vmem>>, %arg3: memref<8x128xf32, #tpu.memory_space<vmem>>) attributes {dimension_semantics = [#tpu.dimension_semantics<arbitrary>], iteration_bounds = array<i64: 1>, scalar_prefetch = 0 : i64, scratch_operands = 0 : i64, tpu.core_type = #tpu.core_type<tc>, window_params = [{transform_indices = @transform_0, window_bounds = array<i64: 16, 128>}, {transform_indices = @transform_1, window_bounds = array<i64: 16, 128>}, {pipeline_mode = #tpu.pipeline_mode<synchronous>, transform_indices = @transform_2, window_bounds = array<i64: 8, 128>}]} {
    %c0_i32 = arith.constant 0 : i32
    %0 = arith.cmpi eq, %arg0, %c0_i32 : i32
    %1 = arith.extui %0 : i1 to i32
    %c0_i32_0 = arith.constant 0 : i32
    %2 = arith.cmpi ne, %1, %c0_i32_0 : i32
    scf.if %2 {
      %cst_9 = arith.constant 0.000000e+00 : f32
      %15 = vector.broadcast %cst_9 : f32 to vector<8x128xf32>
      %c0_10 = arith.constant 0 : index
      %c0_11 = arith.constant 0 : index
      %16 = vector.load %arg3[%c0_10, %c0_11] : memref<8x128xf32, #tpu.memory_space<vmem>>, vector<8x128xf32>
      tpu.vector_store %arg3[%c0_10, %c0_11], %15 {strides = array<i32>} : memref<8x128xf32, #tpu.memory_space<vmem>>, vector<8x128xf32>,
    } else {
    }
    %c0 = arith.constant 0 : index
    %c0_1 = arith.constant 0 : index
    %3 = vector.load %arg1[%c0, %c0_1] : memref<16x128xf32, #tpu.memory_space<vmem>>, vector<16x128xf32>
    %c0_2 = arith.constant 0 : index
    %c0_3 = arith.constant 0 : index
    %4 = vector.load %arg2[%c0_2, %c0_3] : memref<16x128xf32, #tpu.memory_space<vmem>>, vector<16x128xf32>
    %5 = arith.subf %3, %4 : vector<16x128xf32>
    %6 = arith.mulf %5, %5 : vector<16x128xf32>
    %cst = arith.constant 9.99999971E-10 : f32
    %7 = vector.broadcast %cst : f32 to vector<16x128xf32>
    %8 = arith.addf %6, %7 : vector<16x128xf32>
    %9 = math.sqrt %8 : vector<16x128xf32>
    %c0_4 = arith.constant 0 : index
    %c0_5 = arith.constant 0 : index
    %10 = vector.load %arg3[%c0_4, %c0_5] : memref<8x128xf32, #tpu.memory_space<vmem>>, vector<8x128xf32>
    %11 = vector.shape_cast %9 : vector<16x128xf32> to vector<2x8x128xf32>
    %cst_6 = arith.constant dense<0.000000e+00> : vector<8x128xf32>
    %12 = vector.multi_reduction <add>, %11, %cst_6 [0] : vector<2x8x128xf32> to vector<8x128xf32>
    %13 = arith.addf %10, %12 : vector<8x128xf32>
    %c0_7 = arith.constant 0 : index
    %c0_8 = arith.constant 0 : index
    %14 = vector.load %arg3[%c0_7, %c0_8] : memref<8x128xf32, #tpu.memory_space<vmem>>, vector<8x128xf32>
    tpu.vector_store %arg3[%c0_7, %c0_8], %13 {strides = array<i32>} : memref<8x128xf32, #tpu.memory_space<vmem>>, vector<8x128xf32>,
    return
  }
  func.func @transform_0(%arg0: i32) -> (i32, i32) {
    %c0_i32 = arith.constant 0 : i32
    %c0_i32_0 = arith.constant 0 : i32
    return %arg0, %c0_i32 : i32, i32
  }
  func.func @transform_1(%arg0: i32) -> (i32, i32) {
    %c0_i32 = arith.constant 0 : i32
    %c0_i32_0 = arith.constant 0 : i32
    return %arg0, %c0_i32 : i32, i32
  }
  func.func @transform_2(%arg0: i32) -> (i32, i32) {
    %c0_i32 = arith.constant 0 : i32
    %c0_i32_0 = arith.constant 0 : i32
    %c0_i32_1 = arith.constant 0 : i32
    return %c0_i32, %c0_i32_0 : i32, i32
  }
}

</mosaic_0001>

<bundles_post_ra>
// kernel: tpu_custom_call.1
= control target key start
LH: loop header
LB: loop body
LE: loop exit
PB: predicated region body
PF: predicated region fallthrough
CT: control target
= control target key end

     0   :  { %7 = vsyncpa [#allocation3], 0  ;;  %s227_s0 = inlined_call_operand.hbm [shape: f32[16,128], index: 0, kind: input, shape index: {}]   ;;  %s228_s1 = inlined_call_operand.hbm [shape: f32[16,128], index: 1, kind: input, shape index: {}]   ;;  %s229_s2 = inlined_call_operand.hbm [shape: f32[8,128], index: 2, kind: output, shape index: {}]  }
   0x1   :  { %8 = vsyncpa [#allocation6], 0 }
   0x2   :  { %9 = vsyncpa [#allocation4], 0  ;;  %s171_s9 = smov [#allocation2]   ;;  %s99_s13 = scalar_lea.hbm %s227_s0, 256 }
   0x3   :  { %s15_s10 = sshll.u32 %s171_s9, 4  ;;  %p100_p0 = scmp.ne.s32.totalorder %s227_s0, %s99_s13  ;;  %s16_s10 = int_to_ptr.vmem [resolvable:$true] %s15_s10 }
   0x4   :  { %p103_p1 = scmp.lt.u32.totalorder %s99_s13, %s227_s0 }
   0x6   :  { %p105_p2 = pnand %p103_p1, %p100_p0 }
   0x8   :  { %108 = shalt.err (!%p105_p2)
}
   0x9   :  { %s109_s18 = scalar_lea.vmem %s16_s10, 256  ;;  %p114_p4 = scmp.lt.s32.totalorder %s16_s10, %s16_s10 }
   0xa   :  { %p110_p3 = scmp.ne.s32.totalorder %s16_s10, %s109_s18  ;;  %p115_p5 = scmp.lt.s32.totalorder %s109_s18, %s109_s18 }
   0xc   :  { %p116_p6 = por %p115_p5, %p114_p4 }
   0xe   :  { %p117_p7 = pnand %p116_p6, %p110_p3 }
  0x10   :  { %120 = shalt.err (!%p117_p7)
}
  0x11   :  { %s172_s19 = smov 128   ;;  %s173_s20 = smov 8  }
  0x12   :  { %21 = dma.hbm_to_vmem [thread:$0]  %s227_s0, 256, %s16_s10, [#allocation3], %s172_s19, %s172_s19, %s173_s20  }
  0x13   :  { %s174_s23 = smov [#allocation5]   ;;  %s121_s27 = scalar_lea.hbm %s228_s1, 256 }
  0x14   :  { %s27_s24 = sshll.u32 %s174_s23, 4  ;;  %p122_p8 = scmp.ne.s32.totalorder %s228_s1, %s121_s27  ;;  %s28_s24 = int_to_ptr.vmem [resolvable:$true] %s27_s24 }
  0x15   :  { %p125_p9 = scmp.lt.u32.totalorder %s121_s27, %s228_s1 }
  0x17   :  { %p127_p10 = pnand %p125_p9, %p122_p8 }
  0x19   :  { %130 = shalt.err (!%p127_p10)
}
  0x1a   :  { %s131_s4 = scalar_lea.vmem %s28_s24, 256  ;;  %p136_p12 = scmp.lt.s32.totalorder %s28_s24, %s28_s24 }
  0x1b   :  { %p132_p11 = scmp.ne.s32.totalorder %s28_s24, %s131_s4  ;;  %p137_p13 = scmp.lt.s32.totalorder %s131_s4, %s131_s4 }
  0x1d   :  { %p138_p0 = por %p137_p13, %p136_p12 }
  0x1f   :  { %p139_p1 = pnand %p138_p0, %p132_p11 }
  0x21   :  { %142 = shalt.err (!%p139_p1)
}
  0x22   :  { %33 = dma.hbm_to_vmem [thread:$0]  %s228_s1, 256, %s28_s24, [#allocation6], %s172_s19, %s172_s19, %s173_s20  }
  0x23   :  { %165 = dma.done.wait [#allocation3], 256  }
  0x24   :  { %166 = vsyncadd [#allocation3], 4294967040 }
  0x25   :  { %167 = dma.done.wait [#allocation6], 256  }
  0x26   :  { %168 = vsyncadd [#allocation6], 4294967040  ;;  %v45_v0 = vld [vmem:[#allocation2] sm:$0xff]  ;;  %v46_v1 = vld [vmem:[#allocation2 + $0x8] sm:$0xff]  ;;  %s175_s1 = smov [#allocation7]  }
  0x27   :  { %v47_v2 = vld [vmem:[#allocation5] sm:$0xff]  ;;  %v48_v3 = vld [vmem:[#allocation5 + $0x8] sm:$0xff]  ;;  %s79_s6 = sshll.u32 %s175_s1, 4  ;;  %s80_s6 = int_to_ptr.vmem [resolvable:$true] %s79_s6 }
  0x28   :  { %v49_v4 = vsub.f32 %v45_v0, %v47_v2  ;;  %v50_v5 = vsub.f32 %v46_v1, %v48_v3  ;;  %s143_s7 = scalar_lea.vmem %s80_s6, 128  ;;  %p148_p3 = scmp.lt.s32.totalorder %s80_s6, %s80_s6 }
  0x29   :  { %p144_p2 = scmp.ne.s32.totalorder %s80_s6, %s143_s7  ;;  %p149_p4 = scmp.lt.s32.totalorder %s143_s7, %s143_s7 }
  0x2a   :  { %v51_v6 = vmul.f32 %v49_v4, %v49_v4  ;;  %v52_v7 = vmul.f32 %v50_v5, %v50_v5 }
  0x2b   :  { %p150_p5 = por %p149_p4, %p148_p3 }
  0x2c   :  { %v53_v8 = vadd.f32 1e-09, %v51_v6  ;;  %v54_v9 = vadd.f32 1e-09, %v52_v7 }
  0x2d   :  { %p151_p6 = pnand %p150_p5, %p144_p2 }
  0x2e   :  { %95 = vrsqrt.f32 %v53_v8  ;;  %vm57_vm0 = vcmp.eq.f32.partialorder %v53_v8, inf  ;;  %v60_v11 = vand.u32 2147483648, %v53_v8  ;;  %vm59_vm1 = vcmp.eq.f32.partialorder %v53_v8, 0.0 }
  0x2f   :  { %97 = vrsqrt.f32 %v54_v9  ;;  %vm64_vm2 = vcmp.eq.f32.partialorder %v54_v9, inf  ;;  %v67_v14 = vand.u32 2147483648, %v54_v9  ;;  %vm66_vm3 = vcmp.eq.f32.partialorder %v54_v9, 0.0 }
  0x38   :  { %v96_v10 = vpop.eup %95 }
  0x39   :  { %v98_v12 = vpop.eup %97  ;;  %v56_v13 = vmul.f32 %v96_v10, %v53_v8 }
  0x3a   :  { %v63_v15 = vmul.f32 %v98_v12, %v54_v9 }
  0x3b   :  { %v58_v16 = vsel %vm57_vm0, %v53_v8, %v56_v13 }
  0x3c   :  { %v61_v17 = vsel %vm59_vm1, %v60_v11, %v58_v16  ;;  %v65_v18 = vsel %vm64_vm2, %v54_v9, %v63_v15 }
  0x3d   :  { %v68_v19 = vsel %vm66_vm3, %v67_v14, %v65_v18 }
  0x3e   :  { %v70_v20 = vadd.f32 %v68_v19, %v61_v17 }
  0x40   :  { %72 = vst [vmem:[#allocation7] sm:$0xff] %v70_v20 }
  0x41   :  { %154 = shalt.err (!%p151_p6)
}
  0x42   :  { %s155_s10 = scalar_lea.hbm %s229_s2, 128 }
  0x43   :  { %p156_p7 = scmp.ne.s32.totalorder %s229_s2, %s155_s10  ;;  %p159_p8 = scmp.lt.u32.totalorder %s155_s10, %s229_s2 }
  0x45   :  { %p161_p9 = pnand %p159_p8, %p156_p7 }
  0x47   :  { %164 = shalt.err (!%p161_p9)
}
  0x48   :  { %82 = dma.vmem_to_hbm [thread:$0]  %s80_s6, 128, %s229_s2, [#allocation4]  }
  0x49   :  { %169 = dma.done.wait [#allocation4], 128  }
  0x4a   :  { %170 = vsyncadd [#allocation4], 4294967168 }
  0x4b   :  { %86 = vsyncpa [#allocation3], 1 }
  0x4c   :  { %87 = vsyncpa [#allocation6], 1 }
  0x4d   :  { %88 = vsyncpa [#allocation4], 1 }

</bundles_post_ra>
